<compile_context>
chip_gen: v5e
topology: v5e:2x2
jax: 0.10.0
libtpu: 0.0.40
codegen_flags: <defaults>
</compile_context>

<pallas_src>
import functools

import jax
import jax.numpy as jnp
from jax.experimental import pallas as pl
from jax.experimental.pallas import tpu as pltpu

# ---- architecture (matches the torch module) ----
H1, H2, H3, H4 = 132, 100, 64, 32

# ---- padded (lane/sublane aligned) sizes used inside the kernel ----
OBS_PAD = 128          # max supported obs_space_dims (slab W1 block rows)
H1_PAD = 256           # 132 -> 256
H2_PAD = 128           # 100 -> 128
H3_PAD = 128           #  64 -> 128
H4_PAD = 128           #  32 -> 128
STD_COL = 128          # std head starts at lane 128 of the fused head block
ACT_MAX = 128          # max supported action_space_dims

# ---- packed bf16 weight slab layout (one contiguous VMEM DMA) ----
# Every block starts at a row multiple of 16 (bf16 sublane tile) and spans full
# 128-lane multiples -> all static slices are tile-aligned.
_W1_ROW = 0                          # [OBS_PAD, 256]   (x @ W1, cols 0:H1 used)
_W2_ROW = _W1_ROW + OBS_PAD          # [H1_PAD, 128]
_W3_ROW = _W2_ROW + H1_PAD           # [H2_PAD, 128]
_W4_ROW = _W3_ROW + H2_PAD           # [H3_PAD, 128]
_WH_ROW = _W4_ROW + H3_PAD           # [H4_PAD, 256]    mean @ cols 0:, std @ cols 128:
SLAB_ROWS = _WH_ROW + H4_PAD         # 768
SLAB_COLS = H1_PAD                   # 256 (widest layer)
BIAS_ROWS = 8                        # f32 sublane tile; rows 0..4 used


def _bf16_activations_supported():
    """bf16 tanh/exp only pay off on chips with a bf16-native EUP/VPU (v6e/v7x)."""
    try:
        kind = jax.devices()[0].device_kind.lower()
    except Exception:
        return False
    return ("v6" in kind) or ("v7" in kind)


def _policy_kernel(x_ref, p_ref, b_ref, mean_ref, std_ref, *,
                   obs_dim, act_dim, bf16_act):
    f32 = jnp.float32
    bf16 = jnp.bfloat16

    x = x_ref[...].astype(bf16)                                  # [tb, obs_dim]

    # Tile-aligned static slices of the packed bf16 weight slab.
    w1 = p_ref[_W1_ROW:_W1_ROW + obs_dim, :]                     # [obs_dim, 256]
    w2 = p_ref[_W2_ROW:_W2_ROW + H1_PAD, 0:H2_PAD]               # [256, 128]
    w3 = p_ref[_W3_ROW:_W3_ROW + H2_PAD, 0:H3_PAD]               # [128, 128]
    w4 = p_ref[_W4_ROW:_W4_ROW + H3_PAD, 0:H4_PAD]               # [128, 128]
    wh = p_ref[_WH_ROW:_WH_ROW + H4_PAD, :]                      # [128, 256]

    # f32 biases (never quantized to bf16).
    b1 = b_ref[0:1, :]                                           # [1, 256]
    b2 = b_ref[1:2, 0:H2_PAD]
    b3 = b_ref[2:3, 0:H3_PAD]
    b4 = b_ref[3:4, 0:H4_PAD]
    bh = b_ref[4:5, :]                                           # [1, 256]

    def act(z):
        # z is the f32 MXU accumulator (+ bias). Padded lanes are exactly 0
        # (zero weights, zero bias), so tanh keeps them 0.
        if bf16_act:
            return jnp.tanh(z.astype(bf16))        # bf16 EUP (v6e/v7x)
        return jnp.tanh(z).astype(bf16)            # f32 EUP (v5e), cast for MXU

    # shared_net: 4 x (Linear -> Tanh)
    h = act(jnp.dot(x, w1, preferred_element_type=f32) + b1)     # [tb, 256] bf16
    h = act(jnp.dot(h, w2, preferred_element_type=f32) + b2)     # [tb, 128]
    h = act(jnp.dot(h, w3, preferred_element_type=f32) + b3)     # [tb, 128]
    h = act(jnp.dot(h, w4, preferred_element_type=f32) + b4)     # [tb, 128]

    # Fused heads: cols [0, act_dim) = means, cols [128, 128+act_dim) = std pre-act.
    heads = jnp.dot(h, wh, preferred_element_type=f32) + bh      # [tb, 256] f32

    mean_ref[...] = heads[:, 0:act_dim]

    # Softplus == torch.log(1 + torch.exp(z)) except it does not overflow.
    z = heads[:, STD_COL:STD_COL + act_dim]
    std_ref[...] = jnp.maximum(z, 0.0) + jnp.log(1.0 + jnp.exp(-jnp.abs(z)))


def pack_params(params, obs_dim, act_dim, dtype=jnp.bfloat16):
    """Pack weights into one zero-padded bf16 slab + a small f32 bias array."""
    assert obs_dim <= OBS_PAD and act_dim <= ACT_MAX
    slab = jnp.zeros((SLAB_ROWS, SLAB_COLS), jnp.float32)
    # weights are stored [in, out] so the kernel computes x @ W
    slab = slab.at[_W1_ROW:_W1_ROW + obs_dim, :H1].set(params["w1"])
    slab = slab.at[_W2_ROW:_W2_ROW + H1, :H2].set(params["w2"])
    slab = slab.at[_W3_ROW:_W3_ROW + H2, :H3].set(params["w3"])
    slab = slab.at[_W4_ROW:_W4_ROW + H3, :H4].set(params["w4"])
    slab = slab.at[_WH_ROW:_WH_ROW + H4, :act_dim].set(params["wm"])
    slab = slab.at[_WH_ROW:_WH_ROW + H4, STD_COL:STD_COL + act_dim].set(params["ws"])

    bias = jnp.zeros((BIAS_ROWS, SLAB_COLS), jnp.float32)
    bias = bias.at[0, :H1].set(params["b1"][0])
    bias = bias.at[1, :H2].set(params["b2"][0])
    bias = bias.at[2, :H3].set(params["b3"][0])
    bias = bias.at[3, :H4].set(params["b4"][0])
    bias = bias.at[4, :act_dim].set(params["bm"][0])
    bias = bias.at[4, STD_COL:STD_COL + act_dim].set(params["bs"][0])
    return slab.astype(dtype), bias


def _round_up(n, m):
    return ((n + m - 1) // m) * m


def policy_network_forward(x, slab, bias, act_dim, *, tile_b=1024, bf16_act=None):
    """x: [B, obs_dim] f32.  Returns (means, stddevs), each [B, act_dim] f32."""
    B, obs_dim = x.shape
    assert obs_dim <= OBS_PAD and act_dim <= ACT_MAX
    if bf16_act is None:
        bf16_act = _bf16_activations_supported()
    x = x.astype(jnp.float32)
    kernel = functools.partial(_policy_kernel, obs_dim=obs_dim, act_dim=act_dim,
                               bf16_act=bf16_act)
    resident = pl.BlockSpec(memory_space=pltpu.MemorySpace.VMEM)

    if B <= 256:
        # Small batch: single grid point, everything resident in VMEM, 3 input DMAs.
        means, stds = pl.pallas_call(
            kernel,
            out_shape=(jax.ShapeDtypeStruct((B, act_dim), jnp.float32),
                       jax.ShapeDtypeStruct((B, act_dim), jnp.float32)),
            in_specs=[resident, resident, resident],
            out_specs=(resident, resident),
        )(x, slab, bias)
        return means, stds

    # Large batch: 1-D parallel grid over batch tiles. tile_b is clamped so there
    # are always >= 2 grid steps (both v7x TensorCores get work); the weight slab
    # and bias are whole-array resident in VMEM (no per-step double-buffering).
    tb = min(tile_b, _round_up((B + 1) // 2, 8))
    Bp = _round_up(B, tb)
    xp = jnp.pad(x, ((0, Bp - B), (0, 0)))
    means, stds = pl.pallas_call(
        kernel,
        out_shape=(jax.ShapeDtypeStruct((Bp, act_dim), jnp.float32),
                   jax.ShapeDtypeStruct((Bp, act_dim), jnp.float32)),
        grid=(Bp // tb,),
        in_specs=[pl.BlockSpec((tb, obs_dim), lambda i: (i, 0)),
                  resident, resident],
        out_specs=(pl.BlockSpec((tb, act_dim), lambda i: (i, 0)),
                   pl.BlockSpec((tb, act_dim), lambda i: (i, 0))),
        compiler_params=pltpu.CompilerParams(
            dimension_semantics=("parallel",)),
    )(xp, slab, bias)
    return means[:B], stds[:B]


def init_params(key, obs_dim, act_dim):
    """torch.nn.Linear-style init (U[-1/sqrt(fan_in), 1/sqrt(fan_in)]).
    Weights are stored transposed relative to torch ([in, out])."""
    sizes = [(obs_dim, H1), (H1, H2), (H2, H3), (H3, H4), (H4, act_dim), (H4, act_dim)]
    names = ["1", "2", "3", "4", "m", "s"]
    params = {}
    for name, (fan_in, fan_out) in zip(names, sizes):
        key, kw, kb = jax.random.split(key, 3)
        bound = 1.0 / jnp.sqrt(jnp.float32(fan_in))
        params["w" + name] = jax.random.uniform(
            kw, (fan_in, fan_out), jnp.float32, minval=-bound, maxval=bound)
        params["b" + name] = jax.random.uniform(
            kb, (1, fan_out), jnp.float32, minval=-bound, maxval=bound)
    return params


if __name__ == "__main__":
    obs_dim = 16
    act_dim = 4

    key = jax.random.PRNGKey(0)
    key, kx_small, kx_big = jax.random.split(key, 3)
    params = init_params(key, obs_dim, act_dim)
    slab, bias = pack_params(params, obs_dim, act_dim)

    def ref_forward(x):   # pure-JAX f32 reference of the torch module
        h = x
        for n in ["1", "2", "3", "4"]:
            h = jnp.tanh(h @ params["w" + n] + params["b" + n])
        m = h @ params["wm"] + params["bm"]
        s = jnp.log(1.0 + jnp.exp(h @ params["ws"] + params["bs"]))
        return m, s

    # Small batch -> single-grid-point path.
    x_small = jax.random.normal(kx_small, (8, obs_dim), dtype=jnp.float32)
    means, stds = policy_network_forward(x_small, slab, bias, act_dim)
    jax.block_until_ready((means, stds))
    assert means.shape == (8, act_dim) and stds.shape == (8, act_dim)
    rm, rs = ref_forward(x_small)
    # kernel uses bf16 MXU operands -> wider tolerance than f32 parity
    assert jnp.allclose(means, rm, atol=5e-2, rtol=5e-2), (
        float(jnp.max(jnp.abs(means - rm))))
    assert jnp.allclose(stds, rs, atol=5e-2, rtol=5e-2), (
        float(jnp.max(jnp.abs(stds - rs))))

    # Larger batch -> 1-D parallel grid path (>=2 steps, resident weights).
    x_big = jax.random.normal(kx_big, (500, obs_dim), dtype=jnp.float32)
    means_b, stds_b = policy_network_forward(x_big, slab, bias, act_dim)
    jax.block_until_ready((means_b, stds_b))
    assert means_b.shape == (500, act_dim) and stds_b.shape == (500, act_dim)
    rmb, rsb = ref_forward(x_big)
    assert jnp.allclose(means_b, rmb, atol=5e-2, rtol=5e-2), (
        float(jnp.max(jnp.abs(means_b - rmb))))
    assert jnp.allclose(stds_b, rsb, atol=5e-2, rtol=5e-2), (
        float(jnp.max(jnp.abs(stds_b - rsb))))

    print("KERNEL_OK")
</pallas_src>

<mosaic_0001>
module attributes {stable_mosaic.version = 11 : i64} {
  func.func @_policy_kernel(%arg0: memref<8x16xf32, #tpu.memory_space<vmem>>, %arg1: memref<768x256xbf16, #tpu.memory_space<vmem>>, %arg2: memref<8x256xf32, #tpu.memory_space<vmem>>, %arg3: memref<8x4xf32, #tpu.memory_space<vmem>>, %arg4: memref<8x4xf32, #tpu.memory_space<vmem>>) attributes {dimension_semantics = [], scalar_prefetch = 0 : i64, scratch_operands = 0 : i64, tpu.core_type = #tpu.core_type<tc>} {
    %c0 = arith.constant 0 : index
    %c0_0 = arith.constant 0 : index
    %0 = vector.load %arg0[%c0, %c0_0] : memref<8x16xf32, #tpu.memory_space<vmem>>, vector<8x16xf32>
    %1 = arith.truncf %0 : vector<8x16xf32> to vector<8x16xbf16>
    %c0_1 = arith.constant 0 : index
    %c0_2 = arith.constant 0 : index
    %2 = vector.load %arg1[%c0_1, %c0_2] : memref<768x256xbf16, #tpu.memory_space<vmem>>, vector<16x256xbf16>
    %c128 = arith.constant 128 : index
    %c0_3 = arith.constant 0 : index
    %3 = vector.load %arg1[%c128, %c0_3] : memref<768x256xbf16, #tpu.memory_space<vmem>>, vector<256x128xbf16>
    %c384 = arith.constant 384 : index
    %c0_4 = arith.constant 0 : index
    %4 = vector.load %arg1[%c384, %c0_4] : memref<768x256xbf16, #tpu.memory_space<vmem>>, vector<128x128xbf16>
    %c512 = arith.constant 512 : index
    %c0_5 = arith.constant 0 : index
    %5 = vector.load %arg1[%c512, %c0_5] : memref<768x256xbf16, #tpu.memory_space<vmem>>, vector<128x128xbf16>
    %c640 = arith.constant 640 : index
    %c0_6 = arith.constant 0 : index
    %6 = vector.load %arg1[%c640, %c0_6] : memref<768x256xbf16, #tpu.memory_space<vmem>>, vector<128x256xbf16>
    %c0_7 = arith.constant 0 : index
    %c0_8 = arith.constant 0 : index
    %7 = vector.load %arg2[%c0_7, %c0_8] : memref<8x256xf32, #tpu.memory_space<vmem>>, vector<1x256xf32>
    %c1 = arith.constant 1 : index
    %c0_9 = arith.constant 0 : index
    %8 = vector.load %arg2[%c1, %c0_9] : memref<8x256xf32, #tpu.memory_space<vmem>>, vector<1x128xf32>
    %c2 = arith.constant 2 : index
    %c0_10 = arith.constant 0 : index
    %9 = vector.load %arg2[%c2, %c0_10] : memref<8x256xf32, #tpu.memory_space<vmem>>, vector<1x128xf32>
    %c3 = arith.constant 3 : index
    %c0_11 = arith.constant 0 : index
    %10 = vector.load %arg2[%c3, %c0_11] : memref<8x256xf32, #tpu.memory_space<vmem>>, vector<1x128xf32>
    %c4 = arith.constant 4 : index
    %c0_12 = arith.constant 0 : index
    %11 = vector.load %arg2[%c4, %c0_12] : memref<8x256xf32, #tpu.memory_space<vmem>>, vector<1x256xf32>
    %cst = arith.constant dense<0.000000e+00> : vector<8x256xf32>
    %12 = tpu.matmul %1, %2, %cst {dimension_numbers = #tpu.dot_dimension_numbers<[1], [0], [0], [1], [0, 0, 1, 1], [], []>} : vector<8x16xbf16>, vector<16x256xbf16>, vector<8x256xf32> -> vector<8x256xf32>
    %13 = vector.broadcast %7 : vector<1x256xf32> to vector<8x256xf32>
    %14 = arith.addf %12, %13 : vector<8x256xf32>
    %15 = math.tanh %14 : vector<8x256xf32>
    %16 = arith.truncf %15 : vector<8x256xf32> to vector<8x256xbf16>
    %cst_13 = arith.constant dense<0.000000e+00> : vector<8x128xf32>
    %17 = tpu.matmul %16, %3, %cst_13 {dimension_numbers = #tpu.dot_dimension_numbers<[1], [0], [0], [1], [0, 0, 1, 1], [], []>} : vector<8x256xbf16>, vector<256x128xbf16>, vector<8x128xf32> -> vector<8x128xf32>
    %18 = vector.broadcast %8 : vector<1x128xf32> to vector<8x128xf32>
    %19 = arith.addf %17, %18 : vector<8x128xf32>
    %20 = math.tanh %19 : vector<8x128xf32>
    %21 = arith.truncf %20 : vector<8x128xf32> to vector<8x128xbf16>
    %cst_14 = arith.constant dense<0.000000e+00> : vector<8x128xf32>
    %22 = tpu.matmul %21, %4, %cst_14 {dimension_numbers = #tpu.dot_dimension_numbers<[1], [0], [0], [1], [0, 0, 1, 1], [], []>} : vector<8x128xbf16>, vector<128x128xbf16>, vector<8x128xf32> -> vector<8x128xf32>
    %23 = vector.broadcast %9 : vector<1x128xf32> to vector<8x128xf32>
    %24 = arith.addf %22, %23 : vector<8x128xf32>
    %25 = math.tanh %24 : vector<8x128xf32>
    %26 = arith.truncf %25 : vector<8x128xf32> to vector<8x128xbf16>
    %cst_15 = arith.constant dense<0.000000e+00> : vector<8x128xf32>
    %27 = tpu.matmul %26, %5, %cst_15 {dimension_numbers = #tpu.dot_dimension_numbers<[1], [0], [0], [1], [0, 0, 1, 1], [], []>} : vector<8x128xbf16>, vector<128x128xbf16>, vector<8x128xf32> -> vector<8x128xf32>
    %28 = vector.broadcast %10 : vector<1x128xf32> to vector<8x128xf32>
    %29 = arith.addf %27, %28 : vector<8x128xf32>
    %30 = math.tanh %29 : vector<8x128xf32>
    %31 = arith.truncf %30 : vector<8x128xf32> to vector<8x128xbf16>
    %cst_16 = arith.constant dense<0.000000e+00> : vector<8x256xf32>
    %32 = tpu.matmul %31, %6, %cst_16 {dimension_numbers = #tpu.dot_dimension_numbers<[1], [0], [0], [1], [0, 0, 1, 1], [], []>} : vector<8x128xbf16>, vector<128x256xbf16>, vector<8x256xf32> -> vector<8x256xf32>
    %33 = vector.broadcast %11 : vector<1x256xf32> to vector<8x256xf32>
    %34 = arith.addf %32, %33 : vector<8x256xf32>
    %35 = vector.extract_strided_slice %34 {offsets = [0, 0], sizes = [8, 4], strides = [1, 1]} : vector<8x256xf32> to vector<8x4xf32>
    %c0_17 = arith.constant 0 : index
    %c0_18 = arith.constant 0 : index
    %36 = vector.load %arg3[%c0_17, %c0_18] : memref<8x4xf32, #tpu.memory_space<vmem>>, vector<8x4xf32>
    tpu.vector_store %arg3[%c0_17, %c0_18], %35 {strides = array<i32>} : memref<8x4xf32, #tpu.memory_space<vmem>>, vector<8x4xf32>,
    %37 = vector.extract_strided_slice %34 {offsets = [0, 128], sizes = [8, 4], strides = [1, 1]} : vector<8x256xf32> to vector<8x4xf32>
    %cst_19 = arith.constant 0.000000e+00 : f32
    %38 = vector.broadcast %cst_19 : f32 to vector<8x4xf32>
    %39 = arith.maximumf %37, %38 : vector<8x4xf32>
    %40 = math.absf %37 : vector<8x4xf32>
    %cst_20 = arith.constant 0.000000e+00 : f32
    %41 = vector.broadcast %cst_20 : f32 to vector<8x4xf32>
    %42 = arith.subf %41, %40 : vector<8x4xf32>
    %43 = math.exp %42 : vector<8x4xf32>
    %cst_21 = arith.constant 1.000000e+00 : f32
    %44 = vector.broadcast %cst_21 : f32 to vector<8x4xf32>
    %45 = arith.addf %44, %43 : vector<8x4xf32>
    %46 = math.log %45 : vector<8x4xf32>
    %47 = arith.addf %39, %46 : vector<8x4xf32>
    %c0_22 = arith.constant 0 : index
    %c0_23 = arith.constant 0 : index
    %48 = vector.load %arg4[%c0_22, %c0_23] : memref<8x4xf32, #tpu.memory_space<vmem>>, vector<8x4xf32>
    tpu.vector_store %arg4[%c0_22, %c0_23], %47 {strides = array<i32>} : memref<8x4xf32, #tpu.memory_space<vmem>>, vector<8x4xf32>,
    return
  }
}

</mosaic_0001>

<bundles_post_ra>
// kernel: tpu_custom_call.1
= control target key start
LH: loop header
LB: loop body
LE: loop exit
PB: predicated region body
PF: predicated region fallthrough
CT: control target
= control target key end

     0   :  { %10 = vsyncpa [#allocation3], 0  ;;  %s978_s0 = inlined_call_operand.hbm [shape: f32[8,16], index: 0, kind: input, shape index: {}]   ;;  %s979_s1 = inlined_call_operand.hbm [shape: bf16[768,256], index: 1, kind: input, shape index: {}]   ;;  %s980_s2 = inlined_call_operand.hbm [shape: f32[8,256], index: 2, kind: input, shape index: {}]   ;;  %s981_s3 = inlined_call_operand.vmem [shape: f32[8,4], index: 3, kind: output, shape index: {0}]   ;;  %s982_s4 = inlined_call_operand.vmem [shape: f32[8,4], index: 4, kind: output, shape index: {1}]  }
   0x1   :  { %11 = vsyncpa [#allocation5], 0  ;;  %s27_s17 = sshll.u32 %s979_s1, 4  ;;  %s929_s18 = smov [#allocation4]   ;;  %s28_s17 = int_to_ptr.hbm [resolvable:$true] %s27_s17 }
   0x2   :  { %s29_s19 = sshll.u32 %s929_s18, 4  ;;  %s17_s22 = sshll.u32 %s978_s0, 4  ;;  %s30_s19 = int_to_ptr.vmem [resolvable:$true] %s29_s19  ;;  %s18_s22 = int_to_ptr.hbm [resolvable:$true] %s17_s22 }
   0x3   :  { %s930_s23 = smov 128   ;;  %s931_s24 = smov 8  }
   0x4   :  { %35 = dma.hbm_to_vmem [thread:$0]  %s28_s17, 12288, %s30_s19, [#allocation5], %s930_s23, %s930_s23, %s931_s24  }
   0x5   :  { %s932_s25 = smov [#allocation2]   ;;  %s41_s29 = sshll.u32 %s980_s2, 4  ;;  %s42_s29 = int_to_ptr.hbm [resolvable:$true] %s41_s29 }
   0x6   :  { %s19_s26 = sshll.u32 %s932_s25, 4  ;;  %s933_s1 = smov [#allocation6]   ;;  %s20_s26 = int_to_ptr.vmem [resolvable:$true] %s19_s26 }
   0x7   :  { %22 = dma.hbm_to_vmem [thread:$0]  %s18_s22, 128, %s20_s26, [#allocation3]  }
   0x8   :  { %s43_s30 = sshll.u32 %s933_s1, 4  ;;  %s44_s30 = int_to_ptr.vmem [resolvable:$true] %s43_s30 }
   0x9   :  { %46 = dma.hbm_to_vmem [thread:$0]  %s42_s29, 256, %s44_s30, [#allocation5]  }
   0xa   :  { %925 = dma.done.wait [#allocation3], 128  }
   0xb   :  { %926 = vsyncadd [#allocation3], 4294967168 }
   0xc   :  { %927 = dma.done.wait [#allocation5], 12544  }
   0xd   :  { %928 = vsyncadd [#allocation5], 4294954752  ;;  %v584_v0 = vld [vmem:[#allocation4] sm:$0xf]  ;;  %v785_v1 = vld [vmem:[#allocation4 + $0x4] sm:$0xf0] }
   0xe   :  { %v784_v2 = vld [vmem:[#allocation4 + $0x4] sm:$0xf]  ;;  %v585_v3 = vor.u32 %v785_v1, %v584_v0  ;;  %v586_v4 = vld [vmem:[#allocation4 + $0x8] sm:$0xf0]  ;;  %v60_v5 = vld [vmem:[#allocation2] sm:$0xff]  ;;  %vm165_vm0 = vcmask 130048  }
   0xf   :  { %v622_v6 = vld [vmem:[#allocation4 + $0xf0] sm:$0xf]  ;;  %v589_v7 = vor.u32 %v784_v2, %v586_v4  ;;  %v61_v8 = vpack.c.bf16 %v60_v5, %v60_v5  ;;  %v793_v9 = vld [vmem:[#allocation4 + $0xf4] sm:$0xf0]  ;;  %v618_v14 = vld [vmem:[#allocation4 + $0xe0] sm:$0xf] }
  0x10   :  { %v654_v10 = vld [vmem:[#allocation4 + $0x170] sm:$0xf]  ;;  %v801_v11 = vld [vmem:[#allocation4 + $0x174] sm:$0xf0]  ;;  %176 = vmatpush.bf16.msra.mxu0 %v585_v3  ;;  %v623_v12 = vor.u32 %v793_v9, %v622_v6  ;;  %v792_v15 = vld [vmem:[#allocation4 + $0xe4] sm:$0xf0] }
  0x11   :  { %v655_v13 = vor.u32 %v801_v11, %v654_v10  ;;  %v650_v16 = vld [vmem:[#allocation4 + $0x160] sm:$0xf]  ;;  %189 = vmatpush.bf16.msra.mxu1 %v589_v7  ;;  %v800_v17 = vld [vmem:[#allocation4 + $0x164] sm:$0xf0]  ;;  %v619_v18 = vor.u32 %v792_v15, %v618_v14  ;;  %v614_v20 = vld [vmem:[#allocation4 + $0xd0] sm:$0xf] }
  0x12   :  { %295 = vmatpush.bf16.msra.mxu2 %v623_v12  ;;  %v651_v19 = vor.u32 %v800_v17, %v650_v16  ;;  %v791_v21 = vld [vmem:[#allocation4 + $0xd4] sm:$0xf0]  ;;  %v646_v22 = vld [vmem:[#allocation4 + $0x150] sm:$0xf]  ;;  %v610_v26 = vld [vmem:[#allocation4 + $0xc0] sm:$0xf] }
  0x13   :  { %308 = vmatpush.bf16.msra.mxu3 %v655_v13  ;;  %590 = vmatmul.msk.bf16.vlgmr.msra.gmra.mxu0 %vm165_vm0, %v61_v8  ;;  %v799_v23 = vld [vmem:[#allocation4 + $0x154] sm:$0xf0]  ;;  %v615_v24 = vor.u32 %v791_v21, %v614_v20  ;;  %v790_v27 = vld [vmem:[#allocation4 + $0xc4] sm:$0xf0]  ;;  %v642_v28 = vld [vmem:[#allocation4 + $0x140] sm:$0xf] }
  0x14   :  { %591 = vmatmul.msk.bf16.vlgmr.msra.gmra.mxu1 %vm165_vm0, %v61_v8  ;;  %v647_v25 = vor.u32 %v799_v23, %v646_v22  ;;  %v798_v29 = vld [vmem:[#allocation4 + $0x144] sm:$0xf0]  ;;  %v611_v30 = vor.u32 %v790_v27, %v610_v26  ;;  %v606_v32 = vld [vmem:[#allocation4 + $0xb0] sm:$0xf]  ;;  %v789_v33 = vld [vmem:[#allocation4 + $0xb4] sm:$0xf0] }
  0x15   :  { %v643_v31 = vor.u32 %v798_v29, %v642_v28  ;;  %v638_v34 = vld [vmem:[#allocation4 + $0x130] sm:$0xf]  ;;  %v797_v35 = vld [vmem:[#allocation4 + $0x134] sm:$0xf0]  ;;  %v607_v36 = vor.u32 %v789_v33, %v606_v32  ;;  %v602_v38 = vld [vmem:[#allocation4 + $0xa0] sm:$0xf] }
  0x16   :  { %296 = vmatpush.bf16.msra.mxu2 %v619_v18  ;;  %v639_v37 = vor.u32 %v797_v35, %v638_v34  ;;  %v788_v39 = vld [vmem:[#allocation4 + $0xa4] sm:$0xf0]  ;;  %v634_v40 = vld [vmem:[#allocation4 + $0x120] sm:$0xf]  ;;  %v598_v44 = vld [vmem:[#allocation4 + $0x90] sm:$0xf] }
  0x17   :  { %309 = vmatpush.bf16.msra.mxu3 %v651_v19  ;;  %v603_v41 = vor.u32 %v788_v39, %v602_v38  ;;  %v796_v42 = vld [vmem:[#allocation4 + $0x124] sm:$0xf0]  ;;  %v787_v45 = vld [vmem:[#allocation4 + $0x94] sm:$0xf0]  ;;  %v630_v46 = vld [vmem:[#allocation4 + $0x110] sm:$0xf] }
  0x18   :  { %v635_v43 = vor.u32 %v796_v42, %v634_v40  ;;  %v599_v47 = vor.u32 %v787_v45, %v598_v44  ;;  %v795_v48 = vld [vmem:[#allocation4 + $0x114] sm:$0xf0]  ;;  %v594_v50 = vld [vmem:[#allocation4 + $0x80] sm:$0xf]  ;;  %v786_v51 = vld [vmem:[#allocation4 + $0x84] sm:$0xf0] }
  0x19   :  { %v631_v49 = vor.u32 %v795_v48, %v630_v46  ;;  %v626_v52 = vld [vmem:[#allocation4 + $0x100] sm:$0xf]  ;;  %v595_v53 = vor.u32 %v786_v51, %v594_v50  ;;  %v794_v54 = vld [vmem:[#allocation4 + $0x104] sm:$0xf0]  ;;  %v686_v56 = vld [vmem:[#allocation4 + $0x1f0] sm:$0xf] }
  0x1a   :  { %297 = vmatpush.bf16.msra.mxu2 %v615_v24  ;;  %v627_v55 = vor.u32 %v794_v54, %v626_v52  ;;  %v809_v57 = vld [vmem:[#allocation4 + $0x1f4] sm:$0xf0]  ;;  %v682_v58 = vld [vmem:[#allocation4 + $0x1e0] sm:$0xf]  ;;  %v808_v60 = vld [vmem:[#allocation4 + $0x1e4] sm:$0xf0] }
  0x1b   :  { %310 = vmatpush.bf16.msra.mxu3 %v647_v25  ;;  %v687_v59 = vor.u32 %v809_v57, %v686_v56  ;;  %v683_v61 = vor.u32 %v808_v60, %v682_v58  ;;  %v678_v62 = vld [vmem:[#allocation4 + $0x1d0] sm:$0xf]  ;;  %v807_v63 = vld [vmem:[#allocation4 + $0x1d4] sm:$0xf0]  ;;  %v674_v1 = vld [vmem:[#allocation4 + $0x1c0] sm:$0xf] }
  0x1c   :  { %v679_v0 = vor.u32 %v807_v63, %v678_v62  ;;  %v806_v2 = vld [vmem:[#allocation4 + $0x1c4] sm:$0xf0]  ;;  %v670_v4 = vld [vmem:[#allocation4 + $0x1b0] sm:$0xf]  ;;  %v805_v5 = vld [vmem:[#allocation4 + $0x1b4] sm:$0xf0] }
  0x1d   :  { %371 = vmatpush.bf16.msrb.mxu0 %v687_v59  ;;  %v675_v3 = vor.u32 %v806_v2, %v674_v1  ;;  %v144_v6 = vld [vmem:[#allocation6] ss:$8 sm:$0x3]  ;;  %v671_v7 = vor.u32 %v805_v5, %v670_v4  ;;  %v662_v23 = vld [vmem:[#allocation4 + $0x190] sm:$0xf]  ;;  %vm560_vm1 = vcmask 31744  }
  0x1e   :  { %298 = vmatpush.bf16.msra.mxu2 %v611_v30  ;;  %v151_v8 = vperm.slane %v144_v6, 0  ;;  %v152_v9 = vperm.slane %v144_v6, 1  ;;  %v666_v20 = vld [vmem:[#allocation4 + $0x1a0] sm:$0xf]  ;;  %v804_v21 = vld [vmem:[#allocation4 + $0x1a4] sm:$0xf0] }
  0x1f   :  { %311 = vmatpush.bf16.msra.mxu3 %v643_v31  ;;  %v667_v22 = vor.u32 %v804_v21, %v666_v20  ;;  %v803_v24 = vld [vmem:[#allocation4 + $0x194] sm:$0xf0]  ;;  %v658_v26 = vld [vmem:[#allocation4 + $0x180] sm:$0xf]  ;;  %v802_v27 = vld [vmem:[#allocation4 + $0x184] sm:$0xf0] }
  0x20   :  { %v663_v25 = vor.u32 %v803_v24, %v662_v23  ;;  %v659_v28 = vor.u32 %v802_v27, %v658_v26  ;;  %v718_v29 = vld [vmem:[#allocation4 + $0x270] sm:$0xf]  ;;  %v817_v30 = vld [vmem:[#allocation4 + $0x274] sm:$0xf0]  ;;  %v714_v31 = vld [vmem:[#allocation4 + $0x260] sm:$0xf] }
  0x21   :  { %372 = vmatpush.bf16.msrb.mxu0 %v683_v61  ;;  %v719_v32 = vor.u32 %v817_v30, %v718_v29  ;;  %v816_v33 = vld [vmem:[#allocation4 + $0x264] sm:$0xf0]  ;;  %v710_v35 = vld [vmem:[#allocation4 + $0x250] sm:$0xf]  ;;  %v706_v38 = vld [vmem:[#allocation4 + $0x240] sm:$0xf] }
  0x22   :  { %299 = vmatpush.bf16.msra.mxu2 %v607_v36  ;;  %v715_v34 = vor.u32 %v816_v33, %v714_v31  ;;  %v815_v36 = vld [vmem:[#allocation4 + $0x254] sm:$0xf0]  ;;  %v814_v39 = vld [vmem:[#allocation4 + $0x244] sm:$0xf0]  ;;  %v145_v44 = vld [vmem:[#allocation6 + $0x1] ss:$0 sm:$0xff] }
  0x23   :  { %312 = vmatpush.bf16.msra.mxu3 %v639_v37  ;;  %434 = vmatpush.bf16.msrb.mxu1 %v719_v32  ;;  %v711_v37 = vor.u32 %v815_v36, %v710_v35  ;;  %v707_v40 = vor.u32 %v814_v39, %v706_v38  ;;  %v813_v42 = vld [vmem:[#allocation4 + $0x234] sm:$0xf0]  ;;  %v812_v54 = vld [vmem:[#allocation4 + $0x224] sm:$0xf0]  ;;  %v694_v56 = vld [vmem:[#allocation4 + $0x210] sm:$0xf] }
  0x24   :  { %v811_v57 = vld [vmem:[#allocation4 + $0x214] sm:$0xf0]  ;;  %v690_v59 = vld [vmem:[#allocation4 + $0x200] sm:$0xf]  ;;  %v810_v60 = vld [vmem:[#allocation4 + $0x204] sm:$0xf0] }
  0x25   :  { %373 = vmatpush.bf16.msrb.mxu0 %v679_v0  ;;  %v695_v58 = vor.u32 %v811_v57, %v694_v56  ;;  %v691_v61 = vor.u32 %v810_v60, %v690_v59  ;;  %v778_v62 = vld [vmem:[#allocation4 + $0x2f0] sm:$0xf]  ;;  %v833_v63 = vld [vmem:[#allocation4 + $0x2f4] sm:$0xf0]  ;;  %v832_v0 = vld [vmem:[#allocation4 + $0x2f4] sm:$0xf] }
  0x26   :  { %300 = vmatpush.bf16.msra.mxu2 %v603_v41  ;;  %v702_v41 = vld [vmem:[#allocation4 + $0x230] sm:$0xf]  ;;  %v779_v1 = vor.u32 %v833_v63, %v778_v62  ;;  %v780_v2 = vld [vmem:[#allocation4 + $0x2f8] sm:$0xf0]  ;;  %v831_v4 = vld [vmem:[#allocation4 + $0x2e4] sm:$0xf0] }
  0x27   :  { %313 = vmatpush.bf16.msra.mxu3 %v635_v43  ;;  %435 = vmatpush.bf16.msrb.mxu1 %v715_v34  ;;  %v703_v43 = vor.u32 %v813_v42, %v702_v41  ;;  %v783_v5 = vor.u32 %v832_v0, %v780_v2  ;;  %v830_v6 = vld [vmem:[#allocation4 + $0x2e4] sm:$0xf]  ;;  %v825_v23 = vld [vmem:[#allocation4 + $0x2b4] sm:$0xf0]  ;;  %v824_v24 = vld [vmem:[#allocation4 + $0x2b4] sm:$0xf] }
  0x28   :  { %v738_v34 = vld [vmem:[#allocation4 + $0x2a0] sm:$0xf]  ;;  %v823_v35 = vld [vmem:[#allocation4 + $0x2a4] sm:$0xf0]  ;;  %v822_v36 = vld [vmem:[#allocation4 + $0x2a4] sm:$0xf] }
  0x29   :  { %374 = vmatpush.bf16.msrb.mxu0 %v675_v3  ;;  %v770_v3 = vld [vmem:[#allocation4 + $0x2e0] sm:$0xf]  ;;  %v740_v38 = vld [vmem:[#allocation4 + $0x2a8] sm:$0xf0]  ;;  %v821_v41 = vld [vmem:[#allocation4 + $0x294] sm:$0xf0] }
  0x2a   :  { %301 = vmatpush.bf16.msra.mxu2 %v599_v47  ;;  %v743_v39 = vor.u32 %v822_v36, %v740_v38  ;;  %v820_v42 = vld [vmem:[#allocation4 + $0x294] sm:$0xf] }
  0x2b   :  { %314 = vmatpush.bf16.msra.mxu3 %v631_v49  ;;  %436 = vmatpush.bf16.msrb.mxu1 %v711_v37  ;;  %v739_v37 = vor.u32 %v823_v35, %v738_v34 }
  0x2d   :  { %375 = vmatpush.bf16.msrb.mxu0 %v671_v7  ;;  %v772_v7 = vld [vmem:[#allocation4 + $0x2e8] sm:$0xf0] }
  0x2e   :  { %302 = vmatpush.bf16.msra.mxu2 %v595_v53  ;;  %v698_v53 = vld [vmem:[#allocation4 + $0x220] sm:$0xf] }
  0x2f   :  { %315 = vmatpush.bf16.msra.mxu3 %v627_v55  ;;  %437 = vmatpush.bf16.msrb.mxu1 %v707_v40  ;;  %v699_v55 = vor.u32 %v812_v54, %v698_v53  ;;  %v730_v40 = vld [vmem:[#allocation4 + $0x290] sm:$0xf] }
  0x31   :  { %376 = vmatpush.bf16.msrb.mxu0 %v667_v22  ;;  %v746_v22 = vld [vmem:[#allocation4 + $0x2b0] sm:$0xf] }
  0x32   :  { %534 = vmatpush.bf16.msrb.mxu2 %v779_v1  ;;  %v747_v26 = vor.u32 %v825_v23, %v746_v22 }
  0x33   :  { %438 = vmatpush.bf16.msrb.mxu1 %v703_v43  ;;  %547 = vmatpush.bf16.msrb.mxu3 %v783_v5  ;;  %v731_v43 = vor.u32 %v821_v41, %v730_v40 }
  0x35   :  { %377 = vmatpush.bf16.msrb.mxu0 %v663_v25  ;;  %v748_v25 = vld [vmem:[#allocation4 + $0x2b8] sm:$0xf0] }
  0x36   :  { %v751_v27 = vor.u32 %v824_v24, %v748_v25 }
  0x37   :  { %439 = vmatpush.bf16.msrb.mxu1 %v699_v55 }
  0x39   :  { %378 = vmatpush.bf16.msrb.mxu0 %v659_v28  ;;  %v146_v28 = vld [vmem:[#allocation6 + $0x2] ss:$0 sm:$0xff] }
  0x3b   :  { %440 = vmatpush.bf16.msrb.mxu1 %v695_v58  ;;  %v149_v58 = vld [vmem:[#allocation6 + $0x4] ss:$8 sm:$0x3] }
  0x3c   :  { %v450_v59 = vperm.slane %v149_v58, 0  ;;  %v451_v60 = vperm.slane %v149_v58, 1 }
  0x3f   :  { %441 = vmatpush.bf16.msrb.mxu1 %v691_v61 }
  0x90   :  { %v178_v10 = vpop.f32.mrf.mxu0 }
  0x91   :  { %v179_v11 = vadd.f32 %v178_v10, %v151_v8  ;;  %v191_v12 = vpop.f32.mrf.mxu1  ;;  %v771_v8 = vor.u32 %v831_v4, %v770_v3  ;;  %v762_v10 = vld [vmem:[#allocation4 + $0x2d0] sm:$0xf] }
  0x92   :  { %v192_v13 = vadd.f32 %v191_v12, %v152_v9  ;;  %v775_v9 = vor.u32 %v830_v6, %v772_v7  ;;  %v828_v12 = vld [vmem:[#allocation4 + $0x2d4] sm:$0xf] }
  0x93   :  { %839 = vtanh.f32 %v179_v11  ;;  %v829_v11 = vld [vmem:[#allocation4 + $0x2d4] sm:$0xf0]  ;;  %535 = vmatpush.bf16.msrb.mxu2 %v771_v8 }
  0x94   :  { %841 = vtanh.f32 %v192_v13  ;;  %v764_v13 = vld [vmem:[#allocation4 + $0x2d8] sm:$0xf0]  ;;  %548 = vmatpush.bf16.msrb.mxu3 %v775_v9 }
  0x98   :  { %v180_v14 = vpop.f32.mrf.mxu0 }
  0x99   :  { %v840_v15 = vpop.eup %839  ;;  %v193_v16 = vpop.f32.mrf.mxu1  ;;  %v763_v14 = vor.u32 %v829_v11, %v762_v10 }
  0x9a   :  { %v842_v17 = vpop.eup %841  ;;  %v197_v18 = vpack.c.bf16 %v840_v15, %v840_v15  ;;  %v767_v15 = vor.u32 %v828_v12, %v764_v13  ;;  %v754_v16 = vld [vmem:[#allocation4 + $0x2c0] sm:$0xf] }
  0x9b   :  { %v198_v19 = vpack.c.bf16 %v842_v17, %v842_v17  ;;  %v827_v17 = vld [vmem:[#allocation4 + $0x2c4] sm:$0xf0]  ;;  %536 = vmatpush.bf16.msrb.mxu2 %v763_v14 }
  0x9c   :  { %303 = vmatmul.bf16.vlgmr.msra.gmra.mxu2 %v197_v18  ;;  %v826_v18 = vld [vmem:[#allocation4 + $0x2c4] sm:$0xf]  ;;  %v755_v20 = vor.u32 %v827_v17, %v754_v16  ;;  %549 = vmatpush.bf16.msrb.mxu3 %v767_v15 }
  0x9d   :  { %316 = vmatmul.bf16.vlgmr.msra.gmra.mxu3 %v198_v19  ;;  %v756_v19 = vld [vmem:[#allocation4 + $0x2c8] sm:$0xf0] }
  0x9e   :  { %v759_v21 = vor.u32 %v826_v18, %v756_v19 }
  0x9f   :  { %537 = vmatpush.bf16.msrb.mxu2 %v755_v20 }
  0xa0   :  { %550 = vmatpush.bf16.msrb.mxu3 %v759_v21 }
  0xa3   :  { %538 = vmatpush.bf16.msrb.mxu2 %v747_v26 }
  0xa4   :  { %551 = vmatpush.bf16.msrb.mxu3 %v751_v27 }
  0xa7   :  { %539 = vmatpush.bf16.msrb.mxu2 %v739_v37 }
  0xa8   :  { %552 = vmatpush.bf16.msrb.mxu3 %v743_v39 }
  0xab   :  { %540 = vmatpush.bf16.msrb.mxu2 %v731_v43 }
 0x11f   :  { %v304_v45 = vpop.f32.mrf.mxu2 }
 0x120   :  { %v305_v46 = vadd.f32 %v304_v45, %v145_v44  ;;  %v317_v47 = vpop.f32.mrf.mxu3  ;;  %v732_v44 = vld [vmem:[#allocation4 + $0x298] sm:$0xf0] }
 0x121   :  { %v735_v45 = vor.u32 %v820_v42, %v732_v44 }
 0x122   :  { %v318_v48 = vadd.f32 %v317_v47, %v305_v46  ;;  %v722_v46 = vld [vmem:[#allocation4 + $0x280] sm:$0xf]  ;;  %v819_v47 = vld [vmem:[#allocation4 + $0x284] sm:$0xf0] }
 0x123   :  { %553 = vmatpush.bf16.msrb.mxu3 %v735_v45 }
 0x124   :  { %843 = vtanh.f32 %v318_v48  ;;  %v818_v48 = vld [vmem:[#allocation4 + $0x284] sm:$0xf] }
 0x127   :  { %v306_v49 = vpop.f32.mrf.mxu2 }
 0x128   :  { %v319_v50 = vpop.f32.mrf.mxu3  ;;  %v723_v49 = vor.u32 %v819_v47, %v722_v46 }
 0x129   :  { %v724_v50 = vld [vmem:[#allocation4 + $0x288] sm:$0xf0] }
 0x12a   :  { %v844_v51 = vpop.eup %843  ;;  %541 = vmatpush.bf16.msrb.mxu2 %v723_v49 }
 0x12b   :  { %v322_v52 = vpack.c.bf16 %v844_v51, %v844_v51  ;;  %v727_v51 = vor.u32 %v818_v48, %v724_v50 }
 0x12d   :  { %379 = vmatmul.bf16.vlgmr.msrb.gmra.mxu0 %v322_v52  ;;  %554 = vmatpush.bf16.msrb.mxu3 %v727_v51  ;;  %v147_v52 = vld [vmem:[#allocation6 + $0x3] ss:$0 sm:$0xff] }
 0x1aa   :  { %v380_v29 = vpop.f32.mrf.mxu0 }
 0x1ab   :  { %v381_v30 = vadd.f32 %v380_v29, %v146_v28 }
 0x1ad   :  { %845 = vtanh.f32 %v381_v30 }
 0x1b2   :  { %v382_v31 = vpop.f32.mrf.mxu0 }
 0x1b3   :  { %v846_v32 = vpop.eup %845 }
 0x1b4   :  { %v385_v33 = vpack.c.bf16 %v846_v32, %v846_v32 }
 0x1b6   :  { %442 = vmatmul.bf16.vlgmr.msrb.gmra.mxu1 %v385_v33 }
 0x233   :  { %v443_v53 = vpop.f32.mrf.mxu1 }
 0x234   :  { %v444_v54 = vadd.f32 %v443_v53, %v147_v52 }
 0x236   :  { %847 = vtanh.f32 %v444_v54 }
 0x23b   :  { %v445_v55 = vpop.f32.mrf.mxu1 }
 0x23c   :  { %v848_v56 = vpop.eup %847 }
 0x23d   :  { %v448_v57 = vpack.c.bf16 %v848_v56, %v848_v56 }
 0x23f   :  { %542 = vmatmul.bf16.vlgmr.msrb.gmra.mxu2 %v448_v57  ;;  %555 = vmatmul.bf16.vlgmr.msrb.gmra.mxu3 %v448_v57 }
 0x2c2   :  { %v543_v61 = vpop.f32.mrf.mxu2  ;;  %v556_v62 = vpop.f32.mrf.mxu3 }
 0x2c3   :  { %v544_v63 = vadd.f32 %v543_v61, %v450_v59  ;;  %v557_v0 = vadd.f32 %v556_v62, %v451_v60 }
 0x2c5   :  { %561 = vst.msk [vmem:[%s981_s3] sm:$0xff] %vm560_vm1, %v544_v63  ;;  %v563_v1 = vand.u32 2147483647, %v557_v0  ;;  %v562_v9 = vmax.f32 %v557_v0, 0.0 }
 0x2c7   :  { %v564_v2 = vsub.f32 0.0, %v563_v1 }
 0x2c9   :  { %v565_v3 = vmul.f32 1.442695, %v564_v2 }
 0x2ca   :  { %v545_v4 = vpop.f32.mrf.mxu2  ;;  %v558_v5 = vpop.f32.mrf.mxu3 }
 0x2cb   :  { %849 = vpow2.f32 %v565_v3 }
 0x2d1   :  { %v850_v6 = vpop.eup %849 }
 0x2d2   :  { %v567_v7 = vadd.f32 1.0, %v850_v6 }
 0x2d4   :  { %851 = vlog2.f32 %v567_v7 }
 0x2da   :  { %v852_v8 = vpop.eup %851 }
 0x2db   :  { %v569_v10 = vmul.f32 0.6931472, %v852_v8 }
 0x2dd   :  { %v570_v11 = vadd.f32 %v569_v10, %v562_v9 }
 0x2df   :  { %571 = vst.msk [vmem:[%s982_s4] sm:$0xff] %vm560_vm1, %v570_v11 }
 0x2e0   :  { %580 = vsyncpa [#allocation3], 1 }
 0x2e1   :  { %581 = vsyncpa [#allocation5], 1 }

</bundles_post_ra>
